<compile_context>
chip_gen: v5e
topology: v5e:2x2
jax: 0.10.0
libtpu: 0.0.40
codegen_flags: <defaults>
</compile_context>

<pallas_src>
import jax
import jax.numpy as jnp
from jax.experimental import pallas as pl
from jax.experimental.pallas import tpu as pltpu


def linear_kernel(params_ref, x_ref, o_ref):
    # params_ref: SMEM, (K+1,)            -> [w0 .. w_{K-1}, b]
    # x_ref:      VMEM, (K, TILE_R, 128)  feature-major, sublane+lane dense
    # o_ref:      VMEM, (TILE_R, 128)     lane-dense output tile
    k_feat = x_ref.shape[0]
    acc = params_ref[0] * x_ref[0]
    for k in range(1, k_feat):             # static unroll (K = 3)
        acc = acc + params_ref[k] * x_ref[k]
    acc = acc + params_ref[k_feat]          # bias
    o_ref[...] = acc.astype(o_ref.dtype)


def _round_up(v, m):
    return -(-v // m) * m


def multiple_linear_regression(x, w, b, *, tile_rows=2048,
                               min_kernel_batch=32768, force_kernel=False):
    """Forward of nn.Linear(in_features=3, out_features=1).

    x: [N, K] ;  w: [K, M] (transposed vs torch's [M, K]) ;  b: [M] or [1, M]
    returns: [N, M]
    """
    n, k_feat = x.shape
    m = w.shape[-1]

    # Small batches: one fused XLA op beats any pallas_call launch + relayout.
    if (not force_kernel) and (n < min_kernel_batch or m != 1):
        return x @ w + b.reshape(1, m)

    assert m == 1, "kernel path is specialized for out_features == 1"

    # ---- Tile over the batch, folded to a sublane-dense [R, 128] layout ----
    rows = -(-n // 128)                          # ceil(N / 128)
    # Keep >= 2 grid steps when possible so the "parallel" grid axis can be
    # split across v7x's two TensorCores.
    half_rows = _round_up(-(-rows // 2), 8)
    tr = max(8, min(tile_rows, half_rows))
    n_tiles = -(-rows // tr)
    rows_pad = n_tiles * tr
    n_pad = rows_pad * 128

    # Feature-major, batch folded into (rows, 128): every vreg fully dense.
    xt = jnp.transpose(x)                               # [K, N]  (one HBM pass)
    xt = jnp.pad(xt, ((0, 0), (0, n_pad - n)))          # [K, n_pad]
    x3 = xt.reshape(k_feat, rows_pad, 128)              # free reshape

    # 4 scalars (w0, w1, w2, bias) packed for SMEM residence.
    params = jnp.concatenate(
        [w.reshape(-1), b.reshape(-1)]).astype(jnp.float32)      # [K + 1]

    # Double-buffered VMEM footprint (input + output blocks) plus headroom,
    # capped well under v7x's 64 MiB physical VMEM.
    itemsize = jnp.dtype(x.dtype).itemsize
    block_bytes = (k_feat + 1) * tr * 128 * itemsize
    vmem_limit = int(min(2 * block_bytes + (8 << 20), 64 << 20))

    out = pl.pallas_call(
        linear_kernel,
        out_shape=jax.ShapeDtypeStruct((rows_pad, 128), x.dtype),
        grid_spec=pltpu.PrefetchScalarGridSpec(
            num_scalar_prefetch=0,
            grid=(n_tiles,),
            in_specs=[
                # Scalar params: untiled, SMEM-resident across the whole grid.
                pl.BlockSpec(memory_space=pltpu.MemorySpace.SMEM),
                # x: fully dense (K, TILE_R, 128) tiles marching along rows.
                pl.BlockSpec((k_feat, tr, 128), lambda i: (0, i, 0)),
            ],
            out_specs=pl.BlockSpec((tr, 128), lambda i: (i, 0)),
        ),
        compiler_params=pltpu.CompilerParams(
            dimension_semantics=("parallel",),
            vmem_limit_bytes=vmem_limit,
        ),
    )(params, x3)

    # Back to nn.Linear's [N, 1] layout (slice drops the padded tail).
    return out.reshape(n_pad)[:n].reshape(n, m)


if __name__ == "__main__":
    key = jax.random.PRNGKey(0)
    k_x, k_w, k_b, k_x2 = jax.random.split(key, 4)

    in_features, out_features = 3, 1

    # Deterministic params mimicking nn.Linear's U(-1/sqrt(fan_in), +).
    bound = 1.0 / jnp.sqrt(jnp.float32(in_features))
    w = jax.random.uniform(
        k_w, (in_features, out_features), jnp.float32, -bound, bound)
    b = jax.random.uniform(k_b, (1, out_features), jnp.float32, -bound, bound)

    # Small batch through the XLA fallback path (the regime where the kernel
    # would lose to a single fused op).
    x_small = jax.random.normal(k_x, (8, in_features), jnp.float32)
    y_small = jax.block_until_ready(multiple_linear_regression(x_small, w, b))
    y_small_ref = x_small @ w + b
    assert y_small.shape == (8, out_features)
    assert jnp.allclose(y_small, y_small_ref, atol=1e-5, rtol=1e-5)

    # Same small batch forced through the Pallas kernel (single grid step).
    y_small_k = jax.block_until_ready(
        multiple_linear_regression(x_small, w, b, force_kernel=True))
    assert y_small_k.shape == (8, out_features)
    assert jnp.allclose(y_small_k, y_small_ref, atol=1e-5, rtol=1e-5)

    # Non-128-aligned batch forced through the kernel: exercises padding, the
    # sublane-dense relayout, and a 2-step pipelined grid.
    n_big = 5000
    x_big = jax.random.normal(k_x2, (n_big, in_features), jnp.float32)
    y_big = jax.block_until_ready(
        multiple_linear_regression(x_big, w, b, force_kernel=True))
    y_big_ref = x_big @ w + b
    assert y_big.shape == (n_big, out_features)
    assert jnp.allclose(y_big, y_big_ref, atol=1e-5, rtol=1e-5)

    print("KERNEL_OK")
</pallas_src>

<mosaic_0001>
module attributes {stable_mosaic.version = 11 : i64} {
  func.func @linear_kernel(%arg0: i32, %arg1: memref<4xf32, #tpu.memory_space<smem>>, %arg2: memref<3x8x128xf32, #tpu.memory_space<vmem>>, %arg3: memref<8x128xf32, #tpu.memory_space<vmem>>) attributes {dimension_semantics = [#tpu.dimension_semantics<parallel>], iteration_bounds = array<i64: 1>, scalar_prefetch = 0 : i64, scratch_operands = 0 : i64, tpu.core_type = #tpu.core_type<tc>, window_params = [{transform_indices = @transform_0, window_bounds = array<i64: 4>}, {transform_indices = @transform_1, window_bounds = array<i64: 3, 8, 128>}, {transform_indices = @transform_2, window_bounds = array<i64: 8, 128>}]} {
    %c0 = arith.constant 0 : index
    %0 = memref.load %arg1[%c0] : memref<4xf32, #tpu.memory_space<smem>>
    %c0_0 = arith.constant 0 : index
    %c0_1 = arith.constant 0 : index
    %c0_2 = arith.constant 0 : index
    %1 = vector.load %arg2[%c0_0, %c0_1, %c0_2] : memref<3x8x128xf32, #tpu.memory_space<vmem>>, vector<1x8x128xf32>
    %2 = vector.shape_cast %1 : vector<1x8x128xf32> to vector<8x128xf32>
    %3 = vector.broadcast %0 : f32 to vector<8x128xf32>
    %4 = arith.mulf %3, %2 : vector<8x128xf32>
    %c1 = arith.constant 1 : index
    %5 = memref.load %arg1[%c1] : memref<4xf32, #tpu.memory_space<smem>>
    %c1_3 = arith.constant 1 : index
    %c0_4 = arith.constant 0 : index
    %c0_5 = arith.constant 0 : index
    %6 = vector.load %arg2[%c1_3, %c0_4, %c0_5] : memref<3x8x128xf32, #tpu.memory_space<vmem>>, vector<1x8x128xf32>
    %7 = vector.shape_cast %6 : vector<1x8x128xf32> to vector<8x128xf32>
    %8 = vector.broadcast %5 : f32 to vector<8x128xf32>
    %9 = arith.mulf %8, %7 : vector<8x128xf32>
    %10 = arith.addf %4, %9 : vector<8x128xf32>
    %c2 = arith.constant 2 : index
    %11 = memref.load %arg1[%c2] : memref<4xf32, #tpu.memory_space<smem>>
    %c2_6 = arith.constant 2 : index
    %c0_7 = arith.constant 0 : index
    %c0_8 = arith.constant 0 : index
    %12 = vector.load %arg2[%c2_6, %c0_7, %c0_8] : memref<3x8x128xf32, #tpu.memory_space<vmem>>, vector<1x8x128xf32>
    %13 = vector.shape_cast %12 : vector<1x8x128xf32> to vector<8x128xf32>
    %14 = vector.broadcast %11 : f32 to vector<8x128xf32>
    %15 = arith.mulf %14, %13 : vector<8x128xf32>
    %16 = arith.addf %10, %15 : vector<8x128xf32>
    %c3 = arith.constant 3 : index
    %17 = memref.load %arg1[%c3] : memref<4xf32, #tpu.memory_space<smem>>
    %18 = vector.broadcast %17 : f32 to vector<8x128xf32>
    %19 = arith.addf %16, %18 : vector<8x128xf32>
    %c0_9 = arith.constant 0 : index
    %c0_10 = arith.constant 0 : index
    %20 = vector.load %arg3[%c0_9, %c0_10] : memref<8x128xf32, #tpu.memory_space<vmem>>, vector<8x128xf32>
    tpu.vector_store %arg3[%c0_9, %c0_10], %19 {strides = array<i32>} : memref<8x128xf32, #tpu.memory_space<vmem>>, vector<8x128xf32>,
    return
  }
  func.func @transform_0(%arg0: i32) -> i32 {
    %c0_i32 = arith.constant 0 : i32
    %c0_i32_0 = arith.constant 0 : i32
    return %c0_i32 : i32
  }
  func.func @transform_1(%arg0: i32) -> (i32, i32, i32) {
    %c0_i32 = arith.constant 0 : i32
    %c0_i32_0 = arith.constant 0 : i32
    %c0_i32_1 = arith.constant 0 : i32
    return %c0_i32, %arg0, %c0_i32_0 : i32, i32, i32
  }
  func.func @transform_2(%arg0: i32) -> (i32, i32) {
    %c0_i32 = arith.constant 0 : i32
    %c0_i32_0 = arith.constant 0 : i32
    return %arg0, %c0_i32 : i32, i32
  }
}

</mosaic_0001>

<bundles_post_ra>
// kernel: tpu_custom_call.1
= control target key start
LH: loop header
LB: loop body
LE: loop exit
PB: predicated region body
PF: predicated region fallthrough
CT: control target
= control target key end

     0   :  { %7 = vsyncpa [#allocation5], 0  ;;  %s182_s0 = inlined_call_operand.hbm [shape: f32[4], index: 0, kind: input, shape index: {}]   ;;  %s183_s1 = inlined_call_operand.hbm [shape: f32[3,8,128], index: 1, kind: input, shape index: {}]   ;;  %s184_s2 = inlined_call_operand.hbm [shape: f32[8,128], index: 2, kind: output, shape index: {}]  }
   0x1   :  { %8 = vsyncpa [#allocation3], 0 }
   0x2   :  { %9 = vsyncpa [#allocation4], 0  ;;  %s15_s11 = sshll.u32 %s182_s0, 4  ;;  %s23_s14 = sshll.u32 %s183_s1, 4  ;;  %s16_s11 = int_to_ptr.hbm [resolvable:$true] %s15_s11  ;;  %s24_s14 = int_to_ptr.hbm [resolvable:$true] %s23_s14 }
   0x3   :  { %s153_s15 = smov [#allocation2]   ;;  %s154_s16 = smov [#allocation6]  }
   0x4   :  { %18 = dma.hbm_to_smem %s16_s11, 16, %s153_s15, [#allocation5]  }
   0x5   :  { %s25_s17 = sshll.u32 %s154_s16, 4  ;;  %s155_s18 = smov 128   ;;  %s26_s17 = int_to_ptr.vmem [resolvable:$true] %s25_s17 }
   0x6   :  { %s156_s19 = smov 8  }
   0x7   :  { %31 = dma.hbm_to_vmem [thread:$0]  %s24_s14, 384, %s26_s17, [#allocation3], %s155_s18, %s155_s18, %s156_s19  }
   0x8   :  { %147 = dma.done.wait [#allocation5], 16  }
   0x9   :  { %148 = vsyncadd [#allocation5], 4294967280 }
   0xa   :  { %149 = dma.done.wait [#allocation3], 384  }
   0xb   :  { %150 = vsyncadd [#allocation3], 4294966912 }
   0xc   :  { %40 = sfence }
   0xd   :  { %s41_s0 = sld [smem:[#allocation2]]  ;;  %v42_v0 = vld [vmem:[#allocation6] sm:$0xff]  ;;  %v47_v1 = vld [vmem:[#allocation6 + $0x8] sm:$0xff]  ;;  %v53_v3 = vld [vmem:[#allocation6 + $0x10] sm:$0xff]  ;;  %s157_s1 = smov [#allocation7]  }
   0xe   :  { %s79_s20 = sld [smem:[#allocation2 + $0x1]]  ;;  %s66_s23 = sshll.u32 %s157_s1, 4  ;;  %s67_s23 = int_to_ptr.vmem [resolvable:$true] %s66_s23 }
   0xf   :  { %s80_s21 = sld [smem:[#allocation2 + $0x2]]  ;;  %s68_s26 = sshll.u32 %s184_s2, 4  ;;  %s69_s26 = int_to_ptr.hbm [resolvable:$true] %s68_s26 }
  0x10   :  { %s81_s22 = sld [smem:[#allocation2 + $0x3]] }
  0x13   :  { %v43_v2 = vstv %s41_s0 }
  0x14   :  { %v44_v4 = vmul.f32 %v43_v2, %v42_v0  ;;  %v48_v5 = vstv %s79_s20 }
  0x15   :  { %v49_v6 = vmul.f32 %v48_v5, %v47_v1  ;;  %v54_v7 = vstv %s80_s21 }
  0x16   :  { %v55_v8 = vmul.f32 %v54_v7, %v53_v3  ;;  %v58_v10 = vstv %s81_s22 }
  0x17   :  { %v50_v9 = vadd.f32 %v49_v6, %v44_v4 }
  0x19   :  { %v56_v11 = vadd.f32 %v55_v8, %v50_v9 }
  0x1b   :  { %v59_v12 = vadd.f32 %v58_v10, %v56_v11 }
  0x1d   :  { %60 = vst [vmem:[#allocation7] sm:$0xff] %v59_v12 }
  0x1e   :  { %71 = dma.vmem_to_hbm [thread:$0]  %s67_s23, 128, %s69_s26, [#allocation4]  }
  0x1f   :  { %151 = dma.done.wait [#allocation4], 128  }
  0x20   :  { %152 = vsyncadd [#allocation4], 4294967168 }
  0x21   :  { %76 = vsyncpa [#allocation3], 1 }
  0x22   :  { %77 = vsyncpa [#allocation4], 1 }
  0x23   :  { %78 = vsyncpa [#allocation5], 1 }

</bundles_post_ra>
